<compile_context>
chip_gen: v6e
topology: v6e:2x2x1
jax: 0.10.0
libtpu: 0.0.40
codegen_flags: <defaults>
</compile_context>

<pallas_src>
import jax
import jax.numpy as jnp
from jax.experimental import pallas as pl
from jax.experimental.pallas import tpu as pltpu

IN_FEATURES = 512
NUM_CLASSES = 200
PADDED_CLASSES = 256     # multiple of 128 -> lane-dense output stores
NEG_SENTINEL = -1.0e30   # finite "-inf": exp(sentinel - max) underflows to 0


def _round_up(x, m):
    return (x + m - 1) // m * m


def mlp_softmax_kernel(x_ref, w_ref, b_ref, o_ref):
    # MXU matmul with f32 accumulation, bias add, numerically stable softmax.
    logits = jnp.dot(x_ref[...], w_ref[...], preferred_element_type=jnp.float32)
    logits = logits + b_ref[...]                  # (1, Npad) broadcast; pad cols ~ -1e30
    m = jnp.max(logits, axis=1, keepdims=True)
    e = jnp.exp(logits - m)                       # pad columns underflow to 0
    denom = jnp.sum(e, axis=1, keepdims=True)
    inv = pl.reciprocal(denom, approx=False)      # EUP reciprocal; keeps 1e-5 tolerance
    o_ref[...] = (e * inv).astype(o_ref.dtype)


def mynet_forward(x, w, b, *, tile_b=1024, slice_output=True):
    """x: (B, 512) f32, w: (512, 200) f32, b: (200,) f32 -> (B, 200) f32 softmax probs.

    If slice_output=False, returns the padded (B, 256) output (columns 200..255 are
    zero-probability padding) so callers can skip the extra HBM pass of the slice.
    """
    B, K = x.shape
    Kw, N = w.shape
    assert K == Kw == IN_FEATURES and N == NUM_CLASSES

    n_pad = PADDED_CLASSES
    # Pad class axis: zero weight columns + large-negative bias keeps softmax mass
    # entirely on the real 200 classes (exp underflows to 0 in the pad columns).
    w_p = jnp.concatenate([w, jnp.zeros((K, n_pad - N), w.dtype)], axis=1)
    b_p = jnp.concatenate(
        [b, jnp.full((n_pad - N,), NEG_SENTINEL, b.dtype)], axis=0
    ).reshape(1, n_pad)

    # Batch tile: multiple of 8 (f32 sublane); at least 2 grid steps for B > 16 so
    # both v7x TensorCores are busy; capped at tile_b (VMEM-safe on all generations).
    tb = min(tile_b, max(8, _round_up(pl.cdiv(B, 2), 8)))
    grid = (pl.cdiv(B, tb),)  # partial trailing block is masked by Pallas

    cost = pl.CostEstimate(
        flops=2 * B * K * n_pad,
        transcendentals=B * n_pad,
        bytes_accessed=4 * (B * K + K * n_pad + n_pad + B * n_pad),
    )

    out = pl.pallas_call(
        mlp_softmax_kernel,
        out_shape=jax.ShapeDtypeStruct((B, n_pad), jnp.float32),
        grid=grid,
        in_specs=[
            pl.BlockSpec((tb, K), lambda i: (i, 0)),      # x tile: pipelined/double-buffered
            pl.BlockSpec((K, n_pad), lambda i: (0, 0)),   # weight: constant index, stays resident
            pl.BlockSpec((1, n_pad), lambda i: (0, 0)),   # bias: stays resident
        ],
        out_specs=pl.BlockSpec((tb, n_pad), lambda i: (i, 0)),
        compiler_params=pltpu.CompilerParams(
            dimension_semantics=("parallel",),            # megacore-shard batch tiles (v7x)
            vmem_limit_bytes=32 * 1024 * 1024,
        ),
        cost_estimate=cost,
    )(x, w_p, b_p)

    if slice_output:
        # Single column slice to match nn.Linear's (B, 200) output exactly.
        return out[:, :N]
    return out


def init_params(key, in_features=IN_FEATURES, num_classes=NUM_CLASSES):
    # Deterministic init mimicking nn.Linear's default uniform(-1/sqrt(fan_in), 1/sqrt(fan_in)).
    kw, kb = jax.random.split(key)
    bound = 1.0 / jnp.sqrt(jnp.float32(in_features))
    w = jax.random.uniform(kw, (in_features, num_classes), jnp.float32, -bound, bound)
    b = jax.random.uniform(kb, (num_classes,), jnp.float32, -bound, bound)
    return w, b


if __name__ == "__main__":
    key = jax.random.PRNGKey(0)
    kx, kp = jax.random.split(key)

    # Small deterministic example: batch=8 rows of 512 features.
    B = 8
    x = jax.random.normal(kx, (B, IN_FEATURES), jnp.float32)
    w, b = init_params(kp)

    out = jax.block_until_ready(mynet_forward(x, w, b))

    # Sanity check against plain-JAX reference.
    ref = jax.nn.softmax(x @ w + b, axis=1)
    assert out.shape == (B, NUM_CLASSES)
    assert jnp.allclose(out, ref, atol=1e-5, rtol=1e-5)
    assert jnp.allclose(jnp.sum(out, axis=1), 1.0, atol=1e-5)

    # Also exercise multi-tile grid + a masked partial trailing block (B not a
    # multiple of the tile): verifies the no-batch-padding path is correct.
    B2 = 1000
    x2 = jax.random.normal(jax.random.PRNGKey(7), (B2, IN_FEATURES), jnp.float32)
    out2 = jax.block_until_ready(mynet_forward(x2, w, b))
    ref2 = jax.nn.softmax(x2 @ w + b, axis=1)
    assert out2.shape == (B2, NUM_CLASSES)
    assert jnp.allclose(out2, ref2, atol=1e-5, rtol=1e-5)

    print("KERNEL_OK")
</pallas_src>

<mosaic_0001>
module attributes {stable_mosaic.version = 11 : i64} {
  func.func @mlp_softmax_kernel(%arg0: i32, %arg1: memref<8x512xf32, #tpu.memory_space<vmem>>, %arg2: memref<512x256xf32, #tpu.memory_space<vmem>>, %arg3: memref<1x256xf32, #tpu.memory_space<vmem>>, %arg4: memref<8x256xf32, #tpu.memory_space<vmem>>) attributes {dimension_semantics = [#tpu.dimension_semantics<parallel>], iteration_bounds = array<i64: 1>, scalar_prefetch = 0 : i64, scratch_operands = 0 : i64, tpu.core_type = #tpu.core_type<tc>, window_params = [{transform_indices = @transform_0, window_bounds = array<i64: 8, 512>}, {pipeline_mode = #tpu.pipeline_mode<synchronous>, transform_indices = @transform_1, window_bounds = array<i64: 512, 256>}, {pipeline_mode = #tpu.pipeline_mode<synchronous>, transform_indices = @transform_2, window_bounds = array<i64: 1, 256>}, {transform_indices = @transform_3, window_bounds = array<i64: 8, 256>}]} {
    %c0 = arith.constant 0 : index
    %c0_0 = arith.constant 0 : index
    %0 = vector.load %arg1[%c0, %c0_0] : memref<8x512xf32, #tpu.memory_space<vmem>>, vector<8x512xf32>
    %c0_1 = arith.constant 0 : index
    %c0_2 = arith.constant 0 : index
    %1 = vector.load %arg2[%c0_1, %c0_2] : memref<512x256xf32, #tpu.memory_space<vmem>>, vector<512x256xf32>
    %cst = arith.constant dense<0.000000e+00> : vector<8x256xf32>
    %2 = tpu.matmul %0, %1, %cst {dimension_numbers = #tpu.dot_dimension_numbers<[1], [0], [0], [1], [0, 0, 1, 1], [], []>} : vector<8x512xf32>, vector<512x256xf32>, vector<8x256xf32> -> vector<8x256xf32>
    %c0_3 = arith.constant 0 : index
    %c0_4 = arith.constant 0 : index
    %3 = vector.load %arg3[%c0_3, %c0_4] : memref<1x256xf32, #tpu.memory_space<vmem>>, vector<1x256xf32>
    %4 = vector.broadcast %3 : vector<1x256xf32> to vector<8x256xf32>
    %5 = arith.addf %2, %4 : vector<8x256xf32>
    %cst_5 = arith.constant dense<0xFF800000> : vector<8xf32>
    %6 = vector.multi_reduction <maximumf>, %5, %cst_5 [1] : vector<8x256xf32> to vector<8xf32>
    %7 = vector.shape_cast %6 : vector<8xf32> to vector<8x1xf32>
    %8 = vector.broadcast %7 : vector<8x1xf32> to vector<8x256xf32>
    %9 = arith.subf %5, %8 : vector<8x256xf32>
    %10 = math.exp %9 : vector<8x256xf32>
    %cst_6 = arith.constant dense<0.000000e+00> : vector<8xf32>
    %11 = vector.multi_reduction <add>, %10, %cst_6 [1] : vector<8x256xf32> to vector<8xf32>
    %12 = vector.shape_cast %11 : vector<8xf32> to vector<8x1xf32>
    %13 = tpu.reciprocal %12 : vector<8x1xf32> -> vector<8x1xf32>
    %14 = vector.broadcast %13 : vector<8x1xf32> to vector<8x256xf32>
    %15 = arith.mulf %10, %14 : vector<8x256xf32>
    %c0_7 = arith.constant 0 : index
    %c0_8 = arith.constant 0 : index
    %16 = vector.load %arg4[%c0_7, %c0_8] : memref<8x256xf32, #tpu.memory_space<vmem>>, vector<8x256xf32>
    tpu.vector_store %arg4[%c0_7, %c0_8], %15 {strides = array<i32>} : memref<8x256xf32, #tpu.memory_space<vmem>>, vector<8x256xf32>,
    return
  }
  func.func @transform_0(%arg0: i32) -> (i32, i32) {
    %c0_i32 = arith.constant 0 : i32
    %c0_i32_0 = arith.constant 0 : i32
    return %arg0, %c0_i32 : i32, i32
  }
  func.func @transform_1(%arg0: i32) -> (i32, i32) {
    %c0_i32 = arith.constant 0 : i32
    %c0_i32_0 = arith.constant 0 : i32
    %c0_i32_1 = arith.constant 0 : i32
    return %c0_i32, %c0_i32_0 : i32, i32
  }
  func.func @transform_2(%arg0: i32) -> (i32, i32) {
    %c0_i32 = arith.constant 0 : i32
    %c0_i32_0 = arith.constant 0 : i32
    %c0_i32_1 = arith.constant 0 : i32
    return %c0_i32, %c0_i32_0 : i32, i32
  }
  func.func @transform_3(%arg0: i32) -> (i32, i32) {
    %c0_i32 = arith.constant 0 : i32
    %c0_i32_0 = arith.constant 0 : i32
    return %arg0, %c0_i32 : i32, i32
  }
}

</mosaic_0001>

<bundles_post_ra>
// kernel: tpu_custom_call.1
= control target key start
LH: loop header
LB: loop body
LE: loop exit
PB: predicated region body
PF: predicated region fallthrough
CT: control target
= control target key end

     0   :  { %8 = vsyncpa [#allocation3], 0  ;;  %s474_s0 = inlined_call_operand.hbm [shape: f32[8,512], index: 0, kind: input, shape index: {}]   ;;  %s475_s1 = inlined_call_operand.hbm [shape: f32[512,256], index: 1, kind: input, shape index: {}]   ;;  %s476_s2 = inlined_call_operand.vmem [shape: f32[1,256], index: 2, kind: input, shape index: {}]   ;;  %s477_s3 = inlined_call_operand.hbm [shape: f32[8,256], index: 3, kind: output, shape index: {}]  }
   0x1   :  { %9 = vsyncpa [#allocation6], 0 }
   0x2   :  { %10 = vsyncpa [#allocation4], 0  ;;  %s437_s12 = smov [#allocation2]   ;;  %s438_s14 = smov [#allocation5]  }
   0x3   :  { %s17_s13 = sshll.u32 %s437_s12, 4  ;;  %s26_s15 = sshll.u32 %s438_s14, 4  ;;  %s18_s13 = int_to_ptr.vmem [resolvable:$true] %s17_s13  ;;  %s27_s15 = int_to_ptr.vmem [resolvable:$true] %s26_s15 }
   0x4   :  { %s379_s16 = scalar_lea.vmem %s18_s13, 512  ;;  %p384_p1 = scmp.lt.s32.totalorder %s18_s13, %s18_s13 }
   0x5   :  { %p380_p0 = scmp.ne.s32.totalorder %s18_s13, %s379_s16  ;;  %p385_p2 = scmp.lt.s32.totalorder %s379_s16, %s379_s16 }
   0x7   :  { %p386_p3 = por %p385_p2, %p384_p1 }
   0x9   :  { %p387_p4 = pnand %p386_p3, %p380_p0 }
   0xb   :  { %390 = shalt.err (!%p387_p4)
}
   0xc   :  { %20 = dma.hbm_to_vmem [thread:$0]  %s474_s0, 512, %s18_s13, [#allocation3]  }
   0xd   :  { %s399_s19 = scalar_lea.vmem %s27_s15, 16384  ;;  %p404_p6 = scmp.lt.s32.totalorder %s27_s15, %s27_s15 }
   0xe   :  { %p400_p5 = scmp.ne.s32.totalorder %s27_s15, %s399_s19  ;;  %p405_p7 = scmp.lt.s32.totalorder %s399_s19, %s399_s19 }
  0x10   :  { %p406_p8 = por %p405_p7, %p404_p6 }
  0x12   :  { %p407_p9 = pnand %p406_p8, %p400_p5 }
  0x14   :  { %410 = shalt.err (!%p407_p9)
}
  0x15   :  { %s439_s20 = smov 256   ;;  %s440_s21 = smov 16  }
  0x16   :  { %32 = dma.hbm_to_vmem [thread:$0]  %s475_s1, 16384, %s27_s15, [#allocation6], %s439_s20, %s439_s20, %s440_s21  }
  0x17   :  { %431 = dma.done.wait [#allocation3], 512  }
  0x18   :  { %432 = vsyncadd [#allocation3], 4294966784 }
  0x19   :  { %433 = dma.done.wait [#allocation6], 16384  }
  0x1a   :  { %434 = vsyncadd [#allocation6], 4294950912  ;;  %v76_v0 = vld [vmem:[#allocation5 + $0xf8] sm:$0xff]  ;;  %v75_v2 = vld [vmem:[#allocation5 + $0xf0] sm:$0xff] }
  0x1b   :  { %v140_v1 = vld [vmem:[#allocation5 + $0x2f8] sm:$0xff]  ;;  %185 = vmatprep.subr.mxu0 %v76_v0  ;;  %v139_v3 = vld [vmem:[#allocation5 + $0x2f0] sm:$0xff]  ;;  %v74_v4 = vld [vmem:[#allocation5 + $0xe8] sm:$0xff] }
  0x1c   :  { %256 = vmatprep.subr.mxu1 %v140_v1  ;;  %v138_v5 = vld [vmem:[#allocation5 + $0x2e8] sm:$0xff]  ;;  %186 = vmatpush1.msra.mxu0 %v75_v2  ;;  %v73_v6 = vld [vmem:[#allocation5 + $0xe0] sm:$0xff]  ;;  %v72_v8 = vld [vmem:[#allocation5 + $0xd8] sm:$0xff] }
  0x1d   :  { %257 = vmatpush1.msra.mxu1 %v139_v3  ;;  %v137_v7 = vld [vmem:[#allocation5 + $0x2e0] sm:$0xff]  ;;  %187 = vmatprep.subr.mxu0 %v74_v4  ;;  %v136_v9 = vld [vmem:[#allocation5 + $0x2d8] sm:$0xff]  ;;  %v71_v10 = vld [vmem:[#allocation5 + $0xd0] sm:$0xff] }
  0x1e   :  { %258 = vmatprep.subr.mxu1 %v138_v5  ;;  %v135_v11 = vld [vmem:[#allocation5 + $0x2d0] sm:$0xff]  ;;  %188 = vmatpush1.msra.mxu0 %v73_v6  ;;  %v70_v12 = vld [vmem:[#allocation5 + $0xc8] sm:$0xff]  ;;  %v69_v14 = vld [vmem:[#allocation5 + $0xc0] sm:$0xff] }
  0x1f   :  { %259 = vmatpush1.msra.mxu1 %v137_v7  ;;  %v134_v13 = vld [vmem:[#allocation5 + $0x2c8] sm:$0xff]  ;;  %189 = vmatprep.subr.mxu0 %v72_v8  ;;  %v133_v15 = vld [vmem:[#allocation5 + $0x2c0] sm:$0xff]  ;;  %v68_v16 = vld [vmem:[#allocation5 + $0xb8] sm:$0xff] }
  0x20   :  { %260 = vmatprep.subr.mxu1 %v136_v9  ;;  %190 = vmatpush1.msra.mxu0 %v71_v10  ;;  %v132_v17 = vld [vmem:[#allocation5 + $0x2b8] sm:$0xff]  ;;  %v67_v18 = vld [vmem:[#allocation5 + $0xb0] sm:$0xff]  ;;  %v66_v20 = vld [vmem:[#allocation5 + $0xa8] sm:$0xff] }
  0x21   :  { %261 = vmatpush1.msra.mxu1 %v135_v11  ;;  %191 = vmatprep.subr.mxu0 %v70_v12  ;;  %v131_v19 = vld [vmem:[#allocation5 + $0x2b0] sm:$0xff]  ;;  %v130_v21 = vld [vmem:[#allocation5 + $0x2a8] sm:$0xff]  ;;  %v65_v22 = vld [vmem:[#allocation5 + $0xa0] sm:$0xff] }
  0x22   :  { %262 = vmatprep.subr.mxu1 %v134_v13  ;;  %192 = vmatpush1.msra.mxu0 %v69_v14  ;;  %v129_v23 = vld [vmem:[#allocation5 + $0x2a0] sm:$0xff]  ;;  %v64_v24 = vld [vmem:[#allocation5 + $0x98] sm:$0xff]  ;;  %v63_v26 = vld [vmem:[#allocation5 + $0x90] sm:$0xff] }
  0x23   :  { %263 = vmatpush1.msra.mxu1 %v133_v15  ;;  %193 = vmatprep.subr.mxu0 %v68_v16  ;;  %v128_v25 = vld [vmem:[#allocation5 + $0x298] sm:$0xff]  ;;  %v127_v27 = vld [vmem:[#allocation5 + $0x290] sm:$0xff]  ;;  %v62_v28 = vld [vmem:[#allocation5 + $0x88] sm:$0xff] }
  0x24   :  { %264 = vmatprep.subr.mxu1 %v132_v17  ;;  %194 = vmatpush1.msra.mxu0 %v67_v18  ;;  %v126_v29 = vld [vmem:[#allocation5 + $0x288] sm:$0xff]  ;;  %v61_v30 = vld [vmem:[#allocation5 + $0x80] sm:$0xff]  ;;  %v60_v32 = vld [vmem:[#allocation5 + $0x78] sm:$0xff] }
  0x25   :  { %265 = vmatpush1.msra.mxu1 %v131_v19  ;;  %195 = vmatprep.subr.mxu0 %v66_v20  ;;  %v125_v31 = vld [vmem:[#allocation5 + $0x280] sm:$0xff]  ;;  %v124_v33 = vld [vmem:[#allocation5 + $0x278] sm:$0xff]  ;;  %v59_v34 = vld [vmem:[#allocation5 + $0x70] sm:$0xff] }
  0x26   :  { %266 = vmatprep.subr.mxu1 %v130_v21  ;;  %196 = vmatpush1.msra.mxu0 %v65_v22  ;;  %v123_v35 = vld [vmem:[#allocation5 + $0x270] sm:$0xff]  ;;  %v58_v36 = vld [vmem:[#allocation5 + $0x68] sm:$0xff]  ;;  %v57_v38 = vld [vmem:[#allocation5 + $0x60] sm:$0xff] }
  0x27   :  { %267 = vmatpush1.msra.mxu1 %v129_v23  ;;  %197 = vmatprep.subr.mxu0 %v64_v24  ;;  %v122_v37 = vld [vmem:[#allocation5 + $0x268] sm:$0xff]  ;;  %v121_v39 = vld [vmem:[#allocation5 + $0x260] sm:$0xff]  ;;  %v56_v40 = vld [vmem:[#allocation5 + $0x58] sm:$0xff] }
  0x28   :  { %268 = vmatprep.subr.mxu1 %v128_v25  ;;  %198 = vmatpush1.msra.mxu0 %v63_v26  ;;  %v120_v41 = vld [vmem:[#allocation5 + $0x258] sm:$0xff]  ;;  %v55_v42 = vld [vmem:[#allocation5 + $0x50] sm:$0xff]  ;;  %v54_v44 = vld [vmem:[#allocation5 + $0x48] sm:$0xff] }
  0x29   :  { %269 = vmatpush1.msra.mxu1 %v127_v27  ;;  %199 = vmatprep.subr.mxu0 %v62_v28  ;;  %v119_v43 = vld [vmem:[#allocation5 + $0x250] sm:$0xff]  ;;  %v118_v45 = vld [vmem:[#allocation5 + $0x248] sm:$0xff]  ;;  %v53_v46 = vld [vmem:[#allocation5 + $0x40] sm:$0xff] }
  0x2a   :  { %270 = vmatprep.subr.mxu1 %v126_v29  ;;  %200 = vmatpush1.msra.mxu0 %v61_v30  ;;  %v117_v47 = vld [vmem:[#allocation5 + $0x240] sm:$0xff]  ;;  %v52_v48 = vld [vmem:[#allocation5 + $0x38] sm:$0xff]  ;;  %v51_v50 = vld [vmem:[#allocation5 + $0x30] sm:$0xff] }
  0x2b   :  { %271 = vmatpush1.msra.mxu1 %v125_v31  ;;  %201 = vmatprep.subr.mxu0 %v60_v32  ;;  %v116_v49 = vld [vmem:[#allocation5 + $0x238] sm:$0xff]  ;;  %v115_v51 = vld [vmem:[#allocation5 + $0x230] sm:$0xff]  ;;  %v50_v52 = vld [vmem:[#allocation5 + $0x28] sm:$0xff] }
  0x2c   :  { %272 = vmatprep.subr.mxu1 %v124_v33  ;;  %202 = vmatpush1.msra.mxu0 %v59_v34  ;;  %v114_v53 = vld [vmem:[#allocation5 + $0x228] sm:$0xff]  ;;  %v49_v54 = vld [vmem:[#allocation5 + $0x20] sm:$0xff]  ;;  %v48_v56 = vld [vmem:[#allocation5 + $0x18] sm:$0xff] }
  0x2d   :  { %273 = vmatpush1.msra.mxu1 %v123_v35  ;;  %203 = vmatprep.subr.mxu0 %v58_v36  ;;  %v113_v55 = vld [vmem:[#allocation5 + $0x220] sm:$0xff]  ;;  %v112_v57 = vld [vmem:[#allocation5 + $0x218] sm:$0xff]  ;;  %v47_v58 = vld [vmem:[#allocation5 + $0x10] sm:$0xff] }
  0x2e   :  { %274 = vmatprep.subr.mxu1 %v122_v37  ;;  %204 = vmatpush1.msra.mxu0 %v57_v38  ;;  %v111_v59 = vld [vmem:[#allocation5 + $0x210] sm:$0xff]  ;;  %v46_v60 = vld [vmem:[#allocation5 + $0x8] sm:$0xff]  ;;  %v45_v62 = vld [vmem:[#allocation5] sm:$0xff] }
  0x2f   :  { %275 = vmatpush1.msra.mxu1 %v121_v39  ;;  %205 = vmatprep.subr.mxu0 %v56_v40  ;;  %v110_v61 = vld [vmem:[#allocation5 + $0x208] sm:$0xff]  ;;  %v109_v63 = vld [vmem:[#allocation5 + $0x200] sm:$0xff]  ;;  %v108_v0 = vld [vmem:[#allocation5 + $0x1f8] sm:$0xff] }
  0x30   :  { %276 = vmatprep.subr.mxu1 %v120_v41  ;;  %206 = vmatpush1.msra.mxu0 %v55_v42  ;;  %v172_v1 = vld [vmem:[#allocation5 + $0x3f8] sm:$0xff]  ;;  %v107_v2 = vld [vmem:[#allocation5 + $0x1f0] sm:$0xff]  ;;  %v106_v4 = vld [vmem:[#allocation5 + $0x1e8] sm:$0xff] }
  0x31   :  { %277 = vmatpush1.msra.mxu1 %v119_v43  ;;  %207 = vmatprep.subr.mxu0 %v54_v44  ;;  %v171_v3 = vld [vmem:[#allocation5 + $0x3f0] sm:$0xff]  ;;  %v170_v5 = vld [vmem:[#allocation5 + $0x3e8] sm:$0xff]  ;;  %v105_v6 = vld [vmem:[#allocation5 + $0x1e0] sm:$0xff] }
  0x32   :  { %278 = vmatprep.subr.mxu1 %v118_v45  ;;  %208 = vmatpush1.msra.mxu0 %v53_v46  ;;  %v169_v7 = vld [vmem:[#allocation5 + $0x3e0] sm:$0xff]  ;;  %v104_v8 = vld [vmem:[#allocation5 + $0x1d8] sm:$0xff]  ;;  %v103_v10 = vld [vmem:[#allocation5 + $0x1d0] sm:$0xff] }
  0x33   :  { %279 = vmatpush1.msra.mxu1 %v117_v47  ;;  %209 = vmatprep.subr.mxu0 %v52_v48  ;;  %v168_v9 = vld [vmem:[#allocation5 + $0x3d8] sm:$0xff]  ;;  %v167_v11 = vld [vmem:[#allocation5 + $0x3d0] sm:$0xff]  ;;  %v102_v12 = vld [vmem:[#allocation5 + $0x1c8] sm:$0xff] }
  0x34   :  { %280 = vmatprep.subr.mxu1 %v116_v49  ;;  %210 = vmatpush1.msra.mxu0 %v51_v50  ;;  %v166_v13 = vld [vmem:[#allocation5 + $0x3c8] sm:$0xff]  ;;  %v101_v14 = vld [vmem:[#allocation5 + $0x1c0] sm:$0xff]  ;;  %v100_v16 = vld [vmem:[#allocation5 + $0x1b8] sm:$0xff] }
  0x35   :  { %281 = vmatpush1.msra.mxu1 %v115_v51  ;;  %211 = vmatprep.subr.mxu0 %v50_v52  ;;  %v165_v15 = vld [vmem:[#allocation5 + $0x3c0] sm:$0xff]  ;;  %v164_v17 = vld [vmem:[#allocation5 + $0x3b8] sm:$0xff]  ;;  %v99_v18 = vld [vmem:[#allocation5 + $0x1b0] sm:$0xff] }
  0x36   :  { %282 = vmatprep.subr.mxu1 %v114_v53  ;;  %212 = vmatpush1.msra.mxu0 %v49_v54  ;;  %v163_v19 = vld [vmem:[#allocation5 + $0x3b0] sm:$0xff]  ;;  %v98_v20 = vld [vmem:[#allocation5 + $0x1a8] sm:$0xff]  ;;  %v97_v22 = vld [vmem:[#allocation5 + $0x1a0] sm:$0xff] }
  0x37   :  { %283 = vmatpush1.msra.mxu1 %v113_v55  ;;  %213 = vmatprep.subr.mxu0 %v48_v56  ;;  %v162_v21 = vld [vmem:[#allocation5 + $0x3a8] sm:$0xff]  ;;  %v161_v23 = vld [vmem:[#allocation5 + $0x3a0] sm:$0xff]  ;;  %v96_v24 = vld [vmem:[#allocation5 + $0x198] sm:$0xff] }
  0x38   :  { %284 = vmatprep.subr.mxu1 %v112_v57  ;;  %214 = vmatpush1.msra.mxu0 %v47_v58  ;;  %v160_v25 = vld [vmem:[#allocation5 + $0x398] sm:$0xff]  ;;  %v95_v26 = vld [vmem:[#allocation5 + $0x190] sm:$0xff]  ;;  %v94_v28 = vld [vmem:[#allocation5 + $0x188] sm:$0xff] }
  0x39   :  { %285 = vmatpush1.msra.mxu1 %v111_v59  ;;  %215 = vmatprep.subr.mxu0 %v46_v60  ;;  %v159_v27 = vld [vmem:[#allocation5 + $0x390] sm:$0xff]  ;;  %v158_v29 = vld [vmem:[#allocation5 + $0x388] sm:$0xff]  ;;  %v93_v30 = vld [vmem:[#allocation5 + $0x180] sm:$0xff] }
  0x3a   :  { %286 = vmatprep.subr.mxu1 %v110_v61  ;;  %216 = vmatpush1.msra.mxu0 %v45_v62  ;;  %v157_v31 = vld [vmem:[#allocation5 + $0x380] sm:$0xff]  ;;  %v92_v32 = vld [vmem:[#allocation5 + $0x178] sm:$0xff]  ;;  %v91_v34 = vld [vmem:[#allocation5 + $0x170] sm:$0xff] }
  0x3b   :  { %287 = vmatpush1.msra.mxu1 %v109_v63  ;;  %217 = vmatprep.subr.mxu0 %v108_v0  ;;  %v156_v33 = vld [vmem:[#allocation5 + $0x378] sm:$0xff]  ;;  %v155_v35 = vld [vmem:[#allocation5 + $0x370] sm:$0xff]  ;;  %v90_v36 = vld [vmem:[#allocation5 + $0x168] sm:$0xff] }
  0x3c   :  { %288 = vmatprep.subr.mxu1 %v172_v1  ;;  %218 = vmatpush2.msra.mxu0 %v107_v2  ;;  %v154_v37 = vld [vmem:[#allocation5 + $0x368] sm:$0xff]  ;;  %v89_v38 = vld [vmem:[#allocation5 + $0x160] sm:$0xff]  ;;  %v88_v40 = vld [vmem:[#allocation5 + $0x158] sm:$0xff] }
  0x3d   :  { %289 = vmatpush2.msra.mxu1 %v171_v3  ;;  %219 = vmatprep.subr.mxu0 %v106_v4  ;;  %v153_v39 = vld [vmem:[#allocation5 + $0x360] sm:$0xff]  ;;  %v152_v41 = vld [vmem:[#allocation5 + $0x358] sm:$0xff]  ;;  %v87_v42 = vld [vmem:[#allocation5 + $0x150] sm:$0xff]  ;;  %v175_v4 = vlaneseq }
  0x3e   :  { %290 = vmatprep.subr.mxu1 %v170_v5  ;;  %220 = vmatpush2.msra.mxu0 %v105_v6  ;;  %v151_v43 = vld [vmem:[#allocation5 + $0x350] sm:$0xff]  ;;  %v86_v44 = vld [vmem:[#allocation5 + $0x148] sm:$0xff]  ;;  %v85_v46 = vld [vmem:[#allocation5 + $0x140] sm:$0xff] }
  0x3f   :  { %291 = vmatpush2.msra.mxu1 %v169_v7  ;;  %221 = vmatprep.subr.mxu0 %v104_v8  ;;  %v150_v45 = vld [vmem:[#allocation5 + $0x348] sm:$0xff]  ;;  %v149_v47 = vld [vmem:[#allocation5 + $0x340] sm:$0xff]  ;;  %v84_v48 = vld [vmem:[#allocation5 + $0x138] sm:$0xff]  ;;  %v176_v5 = vshrl.u32 %v175_v4, 7 }
  0x40   :  { %292 = vmatprep.subr.mxu1 %v168_v9  ;;  %222 = vmatpush2.msra.mxu0 %v103_v10  ;;  %v148_v49 = vld [vmem:[#allocation5 + $0x338] sm:$0xff]  ;;  %v83_v50 = vld [vmem:[#allocation5 + $0x130] sm:$0xff]  ;;  %v82_v52 = vld [vmem:[#allocation5 + $0x128] sm:$0xff] }
  0x41   :  { %293 = vmatpush2.msra.mxu1 %v167_v11  ;;  %223 = vmatprep.subr.mxu0 %v102_v12  ;;  %v147_v51 = vld [vmem:[#allocation5 + $0x330] sm:$0xff]  ;;  %v146_v53 = vld [vmem:[#allocation5 + $0x328] sm:$0xff]  ;;  %v81_v54 = vld [vmem:[#allocation5 + $0x120] sm:$0xff]  ;;  %v177_v6 = vsub.s32 0, %v176_v5  ;;  %v181_v8 = vsub.s32 1, %v176_v5 }
  0x42   :  { %294 = vmatprep.subr.mxu1 %v166_v13  ;;  %224 = vmatpush2.msra.mxu0 %v101_v14  ;;  %v145_v55 = vld [vmem:[#allocation5 + $0x320] sm:$0xff]  ;;  %v80_v56 = vld [vmem:[#allocation5 + $0x118] sm:$0xff]  ;;  %v79_v58 = vld [vmem:[#allocation5 + $0x110] sm:$0xff] }
  0x43   :  { %295 = vmatpush2.msra.mxu1 %v165_v15  ;;  %225 = vmatprep.subr.mxu0 %v100_v16  ;;  %v144_v57 = vld [vmem:[#allocation5 + $0x318] sm:$0xff]  ;;  %v143_v59 = vld [vmem:[#allocation5 + $0x310] sm:$0xff]  ;;  %v78_v60 = vld [vmem:[#allocation5 + $0x108] sm:$0xff] }
  0x44   :  { %296 = vmatprep.subr.mxu1 %v164_v17  ;;  %226 = vmatpush2.msra.mxu0 %v99_v18  ;;  %v142_v61 = vld [vmem:[#allocation5 + $0x308] sm:$0xff]  ;;  %v77_v62 = vld [vmem:[#allocation5 + $0x100] sm:$0xff]  ;;  %v44_v1 = vld [vmem:[#allocation2 + $0x18] sm:$0xff] }
  0x45   :  { %297 = vmatpush2.msra.mxu1 %v163_v19  ;;  %227 = vmatprep.subr.mxu0 %v98_v20  ;;  %v42_v63 = vld [vmem:[#allocation2 + $0x8] sm:$0xff]  ;;  %v141_v0 = vld [vmem:[#allocation5 + $0x300] sm:$0xff]  ;;  %v43_v3 = vld [vmem:[#allocation2 + $0x10] sm:$0xff] }
  0x46   :  { %298 = vmatprep.subr.mxu1 %v162_v21  ;;  %228 = vmatpush2.msra.mxu0 %v97_v22  ;;  %v41_v2 = vld [vmem:[#allocation2] sm:$0xff] }
  0x47   :  { %299 = vmatpush2.msra.mxu1 %v161_v23  ;;  %229 = vmatprep.subr.mxu0 %v96_v24  ;;  %v173_v7 = vld [vmem:[%s476_s2] sm:$0x3]  ;;  %s441_s2 = smov [#allocation7]  }
  0x48   :  { %300 = vmatprep.subr.mxu1 %v160_v25  ;;  %230 = vmatpush2.msra.mxu0 %v95_v26  ;;  %v178_v9 = vrot.slane %v173_v7, %v177_v6  ;;  %v182_v10 = vrot.slane %v173_v7, %v181_v8  ;;  %s350_s24 = sshll.u32 %s441_s2, 4  ;;  %s351_s24 = int_to_ptr.vmem [resolvable:$true] %s350_s24 }
  0x49   :  { %301 = vmatpush2.msra.mxu1 %v159_v27  ;;  %231 = vmatprep.subr.mxu0 %v94_v28  ;;  %s411_s25 = scalar_lea.vmem %s351_s24, 256  ;;  %p416_p11 = scmp.lt.s32.totalorder %s351_s24, %s351_s24 }
  0x4a   :  { %302 = vmatprep.subr.mxu1 %v158_v29  ;;  %232 = vmatpush2.msra.mxu0 %v93_v30  ;;  %p412_p10 = scmp.ne.s32.totalorder %s351_s24, %s411_s25  ;;  %p417_p12 = scmp.lt.s32.totalorder %s411_s25, %s411_s25 }
  0x4b   :  { %303 = vmatpush2.msra.mxu1 %v157_v31  ;;  %233 = vmatprep.subr.mxu0 %v92_v32 }
  0x4c   :  { %304 = vmatprep.subr.mxu1 %v156_v33  ;;  %234 = vmatpush2.msra.mxu0 %v91_v34  ;;  %p418_p13 = por %p417_p12, %p416_p11 }
  0x4d   :  { %305 = vmatpush2.msra.mxu1 %v155_v35  ;;  %235 = vmatprep.subr.mxu0 %v90_v36 }
  0x4e   :  { %306 = vmatprep.subr.mxu1 %v154_v37  ;;  %236 = vmatpush2.msra.mxu0 %v89_v38  ;;  %p419_p0 = pnand %p418_p13, %p412_p10 }
  0x4f   :  { %307 = vmatpush2.msra.mxu1 %v153_v39  ;;  %237 = vmatprep.subr.mxu0 %v88_v40 }
  0x50   :  { %308 = vmatprep.subr.mxu1 %v152_v41  ;;  %238 = vmatpush2.msra.mxu0 %v87_v42 }
  0x51   :  { %309 = vmatpush2.msra.mxu1 %v151_v43  ;;  %239 = vmatprep.subr.mxu0 %v86_v44 }
  0x52   :  { %310 = vmatprep.subr.mxu1 %v150_v45  ;;  %240 = vmatpush2.msra.mxu0 %v85_v46 }
  0x53   :  { %311 = vmatpush2.msra.mxu1 %v149_v47  ;;  %241 = vmatprep.subr.mxu0 %v84_v48 }
  0x54   :  { %312 = vmatprep.subr.mxu1 %v148_v49  ;;  %242 = vmatpush2.msra.mxu0 %v83_v50 }
  0x55   :  { %313 = vmatpush2.msra.mxu1 %v147_v51  ;;  %243 = vmatprep.subr.mxu0 %v82_v52 }
  0x56   :  { %314 = vmatprep.subr.mxu1 %v146_v53  ;;  %244 = vmatpush2.msra.mxu0 %v81_v54 }
  0x57   :  { %315 = vmatpush2.msra.mxu1 %v145_v55  ;;  %245 = vmatprep.subr.mxu0 %v80_v56 }
  0x58   :  { %316 = vmatprep.subr.mxu1 %v144_v57  ;;  %246 = vmatpush2.msra.mxu0 %v79_v58 }
  0x59   :  { %317 = vmatpush2.msra.mxu1 %v143_v59  ;;  %247 = vmatprep.subr.mxu0 %v78_v60 }
  0x5a   :  { %318 = vmatprep.subr.mxu1 %v142_v61  ;;  %248 = vmatpush2.msra.mxu0 %v77_v62 }
  0x5b   :  { %249 = vmatprep.mubr.f32.mxu0 %v42_v63  ;;  %319 = vmatpush2.msra.mxu1 %v141_v0 }
  0x5c   :  { %320 = vmatprep.mubr.f32.mxu1 %v44_v1  ;;  %250 = vmatmul.mubr.f32.vlgmr.msra.gmra.mxu0 %v41_v2 }
  0x5d   :  { %321 = vmatmul.mubr.f32.vlgmr.msra.gmra.mxu1 %v43_v3 }
 0x11c   :  { %v251_v11 = vpop.f32.mrf.mxu0 }
 0x11d   :  { %v322_v12 = vpop.f32.mrf.mxu1  ;;  %v252_v13 = vadd.f32 %v251_v11, %v178_v9 }
 0x11e   :  { %v253_v14 = vpop.f32.mrf.mxu0 }
 0x11f   :  { %v254_v15 = vadd.f32 %v253_v14, %v182_v10  ;;  %v324_v16 = vpop.f32.mrf.mxu1  ;;  %v323_v17 = vadd.f32 %v322_v12, %v252_v13 }
 0x121   :  { %v325_v18 = vadd.f32 %v324_v16, %v254_v15 }
 0x123   :  { %v327_v19 = vmax.f32 %v323_v17, %v325_v18 }
 0x125   :  { %328 = vmax.xlane.f32.xlu0 %v327_v19 }
 0x1ae   :  { %v329_v20 = vpop.xlane.xlu0 %328 }
 0x1af   :  { %v330_v21 = vsub.f32 %v323_v17, %v329_v20  ;;  %v331_v22 = vsub.f32 %v325_v18, %v329_v20 }
 0x1b1   :  { %v332_v23 = vmul.f32 1.442695, %v330_v21  ;;  %v334_v24 = vmul.f32 1.442695, %v331_v22 }
 0x1b3   :  { %365 = vpow2.f32 %v332_v23 }
 0x1b4   :  { %367 = vpow2.f32 %v334_v24 }
 0x1c0   :  { %v366_v25 = vpop.eup %365 }
 0x1c1   :  { %v368_v26 = vpop.eup %367 }
 0x1c2   :  { %v336_v27 = vadd.f32 %v368_v26, %v366_v25 }
 0x1c4   :  { %337 = vadd.xlane.f32.xlu0 %v336_v27 }
 0x24d   :  { %v338_v28 = vpop.xlane.xlu0 %337 }
 0x24e   :  { %369 = vrcp.f32 %v338_v28 }
 0x25b   :  { %v370_v29 = vpop.eup %369 }
 0x25c   :  { %v340_v30 = vmul.f32 %v370_v29, %v366_v25  ;;  %v341_v31 = vmul.f32 %v370_v29, %v368_v26 }
 0x25e   :  { %342 = vst [vmem:[#allocation7] sm:$0xff] %v340_v30  ;;  %343 = vst [vmem:[#allocation7 + $0x8] sm:$0xff] %v341_v31 }
 0x25f   :  { %422 = shalt.err (!%p419_p0)
}
 0x260   :  { %353 = dma.vmem_to_hbm [thread:$0]  %s351_s24, 256, %s477_s3, [#allocation4]  }
 0x261   :  { %435 = dma.done.wait [#allocation4], 256  }
 0x262   :  { %436 = vsyncadd [#allocation4], 4294967040 }
 0x263   :  { %357 = vsyncpa [#allocation3], 1 }
 0x264   :  { %358 = vsyncpa [#allocation6], 1 }
 0x265   :  { %359 = vsyncpa [#allocation4], 1 }

</bundles_post_ra>
